<compile_context>
chip_gen: v7x
topology: tpu7x:2x2x1
jax: 0.10.0
libtpu: 0.0.40
codegen_flags: <defaults>
</compile_context>

<pallas_src>
import functools

import jax
import jax.numpy as jnp
from jax.experimental import pallas as pl
from jax.experimental.pallas import tpu as pltpu


def _round_up(n, m):
    return ((n + m - 1) // m) * m


def koopman_phi_kernel(x_ref,
                       w1_ref, b1_ref,
                       w2_ref, b2_ref,
                       w3_ref, b3_ref,
                       w4_ref, b4_ref,
                       out_ref):
    # Entire MLP hot path fused: 4 MXU matmuls + VPU bias adds + ReLUs, no HBM
    # round-trips for intermediates (they live in VMEM, managed by the compiler).
    h = jnp.dot(x_ref[...], w1_ref[...], preferred_element_type=jnp.float32) + b1_ref[...]
    h = jnp.maximum(h, 0.0)
    h = jnp.dot(h.astype(w2_ref.dtype), w2_ref[...], preferred_element_type=jnp.float32) + b2_ref[...]
    h = jnp.maximum(h, 0.0)
    h = jnp.dot(h.astype(w3_ref.dtype), w3_ref[...], preferred_element_type=jnp.float32) + b3_ref[...]
    h = jnp.maximum(h, 0.0)
    h = jnp.dot(h.astype(w4_ref.dtype), w4_ref[...], preferred_element_type=jnp.float32) + b4_ref[...]
    out_ref[...] = h.astype(out_ref.dtype)   # (tile, latent_pad) lane-dense, unmasked vst


def pad_output_layer(params):
    """One-time param prep: zero-pad the final layer to a multiple of 128 output
    lanes so the kernel's store is lane-dense. Call ONCE (e.g. after init /
    checkpoint load), not per forward. Returns (padded_params, original_latent)."""
    latent = params["w4"].shape[1]
    latent_pad = _round_up(max(latent, 128), 128)
    if latent_pad != latent:
        params = dict(
            params,
            w4=jnp.pad(params["w4"], ((0, 0), (0, latent_pad - latent))),
            b4=jnp.pad(params["b4"], ((0, 0), (0, latent_pad - latent))),
        )
    return params, latent


def _choose_tile(batch, max_tile, min_steps):
    """Pick the batch tile: big (amortizes ~0.35us/step overhead), but keeping at
    least `min_steps` grid steps (feeds both v7x TensorCores) and ~zero padding."""
    b8 = _round_up(batch, 8)
    nsteps = max(min(min_steps, b8 // 8), pl.cdiv(b8, max_tile), 1)
    return _round_up(pl.cdiv(b8, nsteps), 8)


def koopman_phi_padded(x, params, *, max_tile=1024, min_steps=2, use_bf16=False):
    """Core pallas call. Returns the lane-padded latents, shape [Bp, latent_pad]
    (Bp >= B, latent_pad = round_up(latent, 128)); padded lanes are exact zeros.
    A fused consumer can index [:B, :latent] itself (no extra memory pass)."""
    B, in_dim = x.shape
    hidden = params["w1"].shape[1]
    latent_pad = params["w4"].shape[1]
    assert latent_pad % 128 == 0, "call pad_output_layer(params) once before forward"

    w1, w2, w3, w4 = params["w1"], params["w2"], params["w3"], params["w4"]
    b1, b2, b3, b4 = params["b1"], params["b2"], params["b3"], params["b4"]
    if use_bf16:
        # Opt-in: bf16 operands for the MXU (accumulation stays f32 in-kernel).
        x = x.astype(jnp.bfloat16)
        w1, w2, w3, w4 = (w.astype(jnp.bfloat16) for w in (w1, w2, w3, w4))

    tile = _choose_tile(B, max_tile, min_steps)
    Bp = _round_up(B, tile)
    if Bp != B:
        x = jnp.pad(x, ((0, Bp - B), (0, 0)))   # fuses under jit; near-zero rows by design
    grid = (Bp // tile,)

    def const_spec(arr):
        # Weight/bias: one block == full array, same block index every grid step,
        # so the pipeline keeps it resident in VMEM and never re-issues the DMA.
        return pl.BlockSpec(arr.shape, lambda i: (0,) * arr.ndim)

    in_specs = [
        pl.BlockSpec((tile, in_dim), lambda i: (i, 0)),       # x streamed over batch
        const_spec(w1), const_spec(b1),
        const_spec(w2), const_spec(b2),
        const_spec(w3), const_spec(b3),
        const_spec(w4), const_spec(b4),
    ]
    out_spec = pl.BlockSpec((tile, latent_pad), lambda i: (i, 0))

    wbytes = (w1.size * w1.dtype.itemsize + w2.size * w2.dtype.itemsize
              + w3.size * w3.dtype.itemsize + w4.size * w4.dtype.itemsize
              + b1.size * 4 + b2.size * 4 + b3.size * 4 + b4.size * 4)
    cost = pl.CostEstimate(
        flops=2 * Bp * (in_dim * hidden + 2 * hidden * hidden + hidden * latent_pad),
        transcendentals=0,
        bytes_accessed=Bp * in_dim * x.dtype.itemsize + 4 * Bp * latent_pad + wbytes,
    )

    return pl.pallas_call(
        koopman_phi_kernel,
        out_shape=jax.ShapeDtypeStruct((Bp, latent_pad), jnp.float32),
        grid_spec=pltpu.PrefetchScalarGridSpec(
            num_scalar_prefetch=0,
            grid=grid,
            in_specs=in_specs,
            out_specs=out_spec,
        ),
        compiler_params=pltpu.CompilerParams(
            dimension_semantics=("parallel",),   # batch steps shard across TCs (v7x)
        ),
        cost_estimate=cost,
    )(x, w1, b1, w2, b2, w3, b3, w4, b4)


@functools.partial(jax.jit,
                   static_argnames=("latent", "max_tile", "min_steps", "use_bf16"))
def koopman_forward(x, params, *, latent, max_tile=1024, min_steps=2, use_bf16=False):
    """Koopman.forward(x) == phi(x). `params` must already be lane-padded via
    pad_output_layer; `latent` is the original latent_size. Jit fuses the batch
    pad, the pallas call and the final slice into a single dispatch."""
    z = koopman_phi_padded(x, params, max_tile=max_tile, min_steps=min_steps,
                           use_bf16=use_bf16)
    return z[:x.shape[0], :latent]


def init_params(key, input_size, latent_size, hidden=64):
    # Deterministic synthetic init (mirrors PyTorch layer shapes; not a checkpoint load).
    ks = jax.random.split(key, 8)

    def lin(kw, kb, fan_in, fan_out):
        bound = 1.0 / jnp.sqrt(fan_in)
        w = jax.random.uniform(kw, (fan_in, fan_out), jnp.float32, -bound, bound)
        b = jax.random.uniform(kb, (1, fan_out), jnp.float32, -bound, bound)
        return w, b

    w1, b1 = lin(ks[0], ks[1], input_size, hidden)
    w2, b2 = lin(ks[2], ks[3], hidden, hidden)
    w3, b3 = lin(ks[4], ks[5], hidden, hidden)
    w4, b4 = lin(ks[6], ks[7], hidden, latent_size)
    return dict(w1=w1, b1=b1, w2=w2, b2=b2, w3=w3, b3=b3, w4=w4, b4=b4)


def koopman_forward_ref(x, p):
    h = jnp.maximum(x @ p["w1"] + p["b1"], 0.0)
    h = jnp.maximum(h @ p["w2"] + p["b2"], 0.0)
    h = jnp.maximum(h @ p["w3"] + p["b3"], 0.0)
    return h @ p["w4"] + p["b4"]


if __name__ == "__main__":
    key = jax.random.PRNGKey(0)
    k_x1, k_x2, k_p = jax.random.split(key, 3)

    input_size, latent_size = 32, 16
    raw_params = init_params(k_p, input_size, latent_size, hidden=64)
    params, latent = pad_output_layer(raw_params)   # one-time, outside the forward path

    # Case 1: B=384 -> tile=192, grid=2 "parallel" steps, zero batch padding.
    x1 = jax.random.normal(k_x1, (384, input_size), dtype=jnp.float32)
    z1 = jax.block_until_ready(koopman_forward(x1, params, latent=latent))
    ref1 = koopman_forward_ref(x1, raw_params)
    assert z1.shape == (384, latent_size)
    assert jnp.allclose(z1, ref1, atol=2e-5, rtol=2e-5), \
        "mismatch vs pure-JAX reference (large batch)"

    # Case 2: tiny batch — tile clamps to 8, still 2 grid steps, no padding.
    x2 = jax.random.normal(k_x2, (16, input_size), dtype=jnp.float32)
    z2 = jax.block_until_ready(koopman_forward(x2, params, latent=latent))
    assert z2.shape == (16, latent_size)
    assert jnp.allclose(z2, koopman_forward_ref(x2, raw_params), atol=2e-5, rtol=2e-5), \
        "mismatch vs pure-JAX reference (small batch)"

    # Case 3: opt-in bf16 MXU path (looser numerics by design).
    z1b = jax.block_until_ready(koopman_forward(x1, params, latent=latent, use_bf16=True))
    assert z1b.shape == (384, latent_size)
    assert jnp.allclose(z1b, ref1, atol=1e-1, rtol=1e-1), \
        "mismatch vs pure-JAX reference (bf16 path)"

    # TODO(synk): psi / K / optimize() (Adam training step) are not part of
    # Koopman.forward(x) and are intentionally not lowered to Pallas.
    print("KERNEL_OK")
</pallas_src>

<mosaic_0001>
module attributes {stable_mosaic.version = 11 : i64} {
  func.func @koopman_phi_kernel(%arg0: i32, %arg1: memref<192x32xf32, #tpu.memory_space<vmem>>, %arg2: memref<32x64xf32, #tpu.memory_space<vmem>>, %arg3: memref<1x64xf32, #tpu.memory_space<vmem>>, %arg4: memref<64x64xf32, #tpu.memory_space<vmem>>, %arg5: memref<1x64xf32, #tpu.memory_space<vmem>>, %arg6: memref<64x64xf32, #tpu.memory_space<vmem>>, %arg7: memref<1x64xf32, #tpu.memory_space<vmem>>, %arg8: memref<64x128xf32, #tpu.memory_space<vmem>>, %arg9: memref<1x128xf32, #tpu.memory_space<vmem>>, %arg10: memref<192x128xf32, #tpu.memory_space<vmem>>) attributes {dimension_semantics = [#tpu.dimension_semantics<parallel>], iteration_bounds = array<i64: 2>, scalar_prefetch = 0 : i64, scratch_operands = 0 : i64, tpu.core_type = #tpu.core_type<tc>, window_params = [{transform_indices = @transform_0, window_bounds = array<i64: 192, 32>}, {pipeline_mode = #tpu.pipeline_mode<synchronous>, transform_indices = @transform_1, window_bounds = array<i64: 32, 64>}, {pipeline_mode = #tpu.pipeline_mode<synchronous>, transform_indices = @transform_2, window_bounds = array<i64: 1, 64>}, {pipeline_mode = #tpu.pipeline_mode<synchronous>, transform_indices = @transform_3, window_bounds = array<i64: 64, 64>}, {pipeline_mode = #tpu.pipeline_mode<synchronous>, transform_indices = @transform_4, window_bounds = array<i64: 1, 64>}, {pipeline_mode = #tpu.pipeline_mode<synchronous>, transform_indices = @transform_5, window_bounds = array<i64: 64, 64>}, {pipeline_mode = #tpu.pipeline_mode<synchronous>, transform_indices = @transform_6, window_bounds = array<i64: 1, 64>}, {pipeline_mode = #tpu.pipeline_mode<synchronous>, transform_indices = @transform_7, window_bounds = array<i64: 64, 128>}, {pipeline_mode = #tpu.pipeline_mode<synchronous>, transform_indices = @transform_8, window_bounds = array<i64: 1, 128>}, {transform_indices = @transform_9, window_bounds = array<i64: 192, 128>}]} {
    %c0 = arith.constant 0 : index
    %c0_0 = arith.constant 0 : index
    %0 = vector.load %arg1[%c0, %c0_0] : memref<192x32xf32, #tpu.memory_space<vmem>>, vector<192x32xf32>
    %c0_1 = arith.constant 0 : index
    %c0_2 = arith.constant 0 : index
    %1 = vector.load %arg2[%c0_1, %c0_2] : memref<32x64xf32, #tpu.memory_space<vmem>>, vector<32x64xf32>
    %cst = arith.constant dense<0.000000e+00> : vector<192x64xf32>
    %2 = tpu.matmul %0, %1, %cst {dimension_numbers = #tpu.dot_dimension_numbers<[1], [0], [0], [1], [0, 0, 1, 1], [], []>} : vector<192x32xf32>, vector<32x64xf32>, vector<192x64xf32> -> vector<192x64xf32>
    %c0_3 = arith.constant 0 : index
    %c0_4 = arith.constant 0 : index
    %3 = vector.load %arg3[%c0_3, %c0_4] : memref<1x64xf32, #tpu.memory_space<vmem>>, vector<1x64xf32>
    %4 = vector.broadcast %3 : vector<1x64xf32> to vector<192x64xf32>
    %5 = arith.addf %2, %4 : vector<192x64xf32>
    %cst_5 = arith.constant 0.000000e+00 : f32
    %6 = vector.broadcast %cst_5 : f32 to vector<192x64xf32>
    %7 = arith.maximumf %5, %6 : vector<192x64xf32>
    %c0_6 = arith.constant 0 : index
    %c0_7 = arith.constant 0 : index
    %8 = vector.load %arg4[%c0_6, %c0_7] : memref<64x64xf32, #tpu.memory_space<vmem>>, vector<64x64xf32>
    %cst_8 = arith.constant dense<0.000000e+00> : vector<192x64xf32>
    %9 = tpu.matmul %7, %8, %cst_8 {dimension_numbers = #tpu.dot_dimension_numbers<[1], [0], [0], [1], [0, 0, 1, 1], [], []>} : vector<192x64xf32>, vector<64x64xf32>, vector<192x64xf32> -> vector<192x64xf32>
    %c0_9 = arith.constant 0 : index
    %c0_10 = arith.constant 0 : index
    %10 = vector.load %arg5[%c0_9, %c0_10] : memref<1x64xf32, #tpu.memory_space<vmem>>, vector<1x64xf32>
    %11 = vector.broadcast %10 : vector<1x64xf32> to vector<192x64xf32>
    %12 = arith.addf %9, %11 : vector<192x64xf32>
    %cst_11 = arith.constant 0.000000e+00 : f32
    %13 = vector.broadcast %cst_11 : f32 to vector<192x64xf32>
    %14 = arith.maximumf %12, %13 : vector<192x64xf32>
    %c0_12 = arith.constant 0 : index
    %c0_13 = arith.constant 0 : index
    %15 = vector.load %arg6[%c0_12, %c0_13] : memref<64x64xf32, #tpu.memory_space<vmem>>, vector<64x64xf32>
    %cst_14 = arith.constant dense<0.000000e+00> : vector<192x64xf32>
    %16 = tpu.matmul %14, %15, %cst_14 {dimension_numbers = #tpu.dot_dimension_numbers<[1], [0], [0], [1], [0, 0, 1, 1], [], []>} : vector<192x64xf32>, vector<64x64xf32>, vector<192x64xf32> -> vector<192x64xf32>
    %c0_15 = arith.constant 0 : index
    %c0_16 = arith.constant 0 : index
    %17 = vector.load %arg7[%c0_15, %c0_16] : memref<1x64xf32, #tpu.memory_space<vmem>>, vector<1x64xf32>
    %18 = vector.broadcast %17 : vector<1x64xf32> to vector<192x64xf32>
    %19 = arith.addf %16, %18 : vector<192x64xf32>
    %cst_17 = arith.constant 0.000000e+00 : f32
    %20 = vector.broadcast %cst_17 : f32 to vector<192x64xf32>
    %21 = arith.maximumf %19, %20 : vector<192x64xf32>
    %c0_18 = arith.constant 0 : index
    %c0_19 = arith.constant 0 : index
    %22 = vector.load %arg8[%c0_18, %c0_19] : memref<64x128xf32, #tpu.memory_space<vmem>>, vector<64x128xf32>
    %cst_20 = arith.constant dense<0.000000e+00> : vector<192x128xf32>
    %23 = tpu.matmul %21, %22, %cst_20 {dimension_numbers = #tpu.dot_dimension_numbers<[1], [0], [0], [1], [0, 0, 1, 1], [], []>} : vector<192x64xf32>, vector<64x128xf32>, vector<192x128xf32> -> vector<192x128xf32>
    %c0_21 = arith.constant 0 : index
    %c0_22 = arith.constant 0 : index
    %24 = vector.load %arg9[%c0_21, %c0_22] : memref<1x128xf32, #tpu.memory_space<vmem>>, vector<1x128xf32>
    %25 = vector.broadcast %24 : vector<1x128xf32> to vector<192x128xf32>
    %26 = arith.addf %23, %25 : vector<192x128xf32>
    %c0_23 = arith.constant 0 : index
    %c0_24 = arith.constant 0 : index
    %27 = vector.load %arg10[%c0_23, %c0_24] : memref<192x128xf32, #tpu.memory_space<vmem>>, vector<192x128xf32>
    tpu.vector_store %arg10[%c0_23, %c0_24], %26 {strides = array<i32>} : memref<192x128xf32, #tpu.memory_space<vmem>>, vector<192x128xf32>,
    return
  }
  func.func @transform_0(%arg0: i32) -> (i32, i32) {
    %c0_i32 = arith.constant 0 : i32
    %c0_i32_0 = arith.constant 0 : i32
    return %arg0, %c0_i32 : i32, i32
  }
  func.func @transform_1(%arg0: i32) -> (i32, i32) {
    %c0_i32 = arith.constant 0 : i32
    %c0_i32_0 = arith.constant 0 : i32
    %c0_i32_1 = arith.constant 0 : i32
    return %c0_i32, %c0_i32_0 : i32, i32
  }
  func.func @transform_2(%arg0: i32) -> (i32, i32) {
    %c0_i32 = arith.constant 0 : i32
    %c0_i32_0 = arith.constant 0 : i32
    %c0_i32_1 = arith.constant 0 : i32
    return %c0_i32, %c0_i32_0 : i32, i32
  }
  func.func @transform_3(%arg0: i32) -> (i32, i32) {
    %c0_i32 = arith.constant 0 : i32
    %c0_i32_0 = arith.constant 0 : i32
    %c0_i32_1 = arith.constant 0 : i32
    return %c0_i32, %c0_i32_0 : i32, i32
  }
  func.func @transform_4(%arg0: i32) -> (i32, i32) {
    %c0_i32 = arith.constant 0 : i32
    %c0_i32_0 = arith.constant 0 : i32
    %c0_i32_1 = arith.constant 0 : i32
    return %c0_i32, %c0_i32_0 : i32, i32
  }
  func.func @transform_5(%arg0: i32) -> (i32, i32) {
    %c0_i32 = arith.constant 0 : i32
    %c0_i32_0 = arith.constant 0 : i32
    %c0_i32_1 = arith.constant 0 : i32
    return %c0_i32, %c0_i32_0 : i32, i32
  }
  func.func @transform_6(%arg0: i32) -> (i32, i32) {
    %c0_i32 = arith.constant 0 : i32
    %c0_i32_0 = arith.constant 0 : i32
    %c0_i32_1 = arith.constant 0 : i32
    return %c0_i32, %c0_i32_0 : i32, i32
  }
  func.func @transform_7(%arg0: i32) -> (i32, i32) {
    %c0_i32 = arith.constant 0 : i32
    %c0_i32_0 = arith.constant 0 : i32
    %c0_i32_1 = arith.constant 0 : i32
    return %c0_i32, %c0_i32_0 : i32, i32
  }
  func.func @transform_8(%arg0: i32) -> (i32, i32) {
    %c0_i32 = arith.constant 0 : i32
    %c0_i32_0 = arith.constant 0 : i32
    %c0_i32_1 = arith.constant 0 : i32
    return %c0_i32, %c0_i32_0 : i32, i32
  }
  func.func @transform_9(%arg0: i32) -> (i32, i32) {
    %c0_i32 = arith.constant 0 : i32
    %c0_i32_0 = arith.constant 0 : i32
    return %arg0, %c0_i32 : i32, i32
  }
}

</mosaic_0001>

<bundles_post_ra>
// kernel: koopman_forward.1
= control target key start
LH: loop header
LB: loop body
LE: loop exit
PB: predicated region body
PF: predicated region fallthrough
CT: control target
= control target key end

     0   :  { %s2161_s30 = smov 0   ;;  %s2533_s0 = inlined_call_operand.vmem [shape: f32[384,32], index: 0, kind: input, shape index: {}]   ;;  %s2534_s1 = inlined_call_operand.vmem [shape: f32[32,64], index: 1, kind: input, shape index: {}]   ;;  %s2535_s2 = inlined_call_operand.vmem [shape: f32[1,64], index: 2, kind: input, shape index: {}]   ;;  %s2536_s3 = inlined_call_operand.vmem [shape: f32[64,64], index: 3, kind: input, shape index: {}]   ;;  %s2537_s4 = inlined_call_operand.vmem [shape: f32[1,64], index: 4, kind: input, shape index: {}]   ;;  %s2538_s5 = inlined_call_operand.vmem [shape: f32[64,64], index: 5, kind: input, shape index: {}]   ;;  %s2539_s6 = inlined_call_operand.vmem [shape: f32[1,64], index: 6, kind: input, shape index: {}]   ;;  %s2540_s7 = inlined_call_operand.vmem [shape: f32[64,128], index: 7, kind: input, shape index: {}]   ;;  %s2541_s8 = inlined_call_operand.vmem [shape: f32[1,128], index: 8, kind: input, shape index: {}]   ;;  %s2542_s9 = inlined_call_operand.vmem [shape: f32[384,128], index: 9, kind: output, shape index: {}]  }
   0x1 LB: > { %s1598_s10 = sadd.s32 4294967295, %s2109_s30   ;;  %p1602_p0 = scmp.ge.s32.totalorder %s2109_s30, 1  ;;  %s2109_s30 = sphi %s2161_s30, %s19_s30  }
   0x2   : > { %p288_p1 = scmp.lt.s32.totalorder %s2109_s30, 3 }
   0x4   : > { %p289_p2 = pnand %p1602_p0, %p288_p1 }
   0x5   : > { %v360_v0 = vld [vmem:[%s2534_s1] sm:$0xff] (!%p289_p2)  ;;  %v361_v1 = vld [vmem:[%s2534_s1 + $0x8] sm:$0xff] (!%p289_p2)  ;;  %v362_v2 = vld [vmem:[%s2534_s1 + $0x10] sm:$0xff] (!%p289_p2)  ;;  %s324_s17 = smul.u32 (!%p289_p2), 24, %s1598_s10  ;;  %vm371_vm0 = vcmask (!%p289_p2), 261120   ;;  %vm668_vm1 = vcmask (!%p289_p2), 523264  }
   0x6   : > { %292 = sbr.rel (%p289_p2) target bundleno = 932 (0x3a4), region = 56  ;;  %v2031_v3 = vpack.c.bf16 (!%p289_p2), %v361_v1, %v360_v0  ;;  %v363_v4 = vld [vmem:[%s2534_s1 + $0x18] sm:$0xff] (!%p289_p2)  ;;  %v653_v5 = vld [vmem:[%s2536_s3] sm:$0xff] (!%p289_p2)  ;;  %v654_v6 = vld [vmem:[%s2536_s3 + $0x8] sm:$0xff] (!%p289_p2) }
   0x7   : > { %v2035_v7 = vpack.c.bf16 (!%p289_p2), %v363_v4, %v362_v2  ;;  %p325_p3 = scmp.lt.s32.totalorder (!%p289_p2), %s324_s17, 47  ;;  %v2039_v8 = vpack.c.bf16 (!%p289_p2), %v654_v6, %v653_v5  ;;  %v655_v9 = vld [vmem:[%s2536_s3 + $0x10] sm:$0xff] (!%p289_p2)  ;;  %v656_v10 = vld [vmem:[%s2536_s3 + $0x18] sm:$0xff] (!%p289_p2)  ;;  %v657_v12 = vld [vmem:[%s2536_s3 + $0x20] sm:$0xff] (!%p289_p2) }
   0x8   : > { %2032 = vmatprep.subr.bf16.mxu0 (!%p289_p2), %v2031_v3  ;;  %v2043_v11 = vpack.c.bf16 (!%p289_p2), %v656_v10, %v655_v9  ;;  %v658_v13 = vld [vmem:[%s2536_s3 + $0x28] sm:$0xff] (!%p289_p2)  ;;  %v659_v39 = vld [vmem:[%s2536_s3 + $0x30] sm:$0xff] (!%p289_p2)  ;;  %v660_v40 = vld [vmem:[%s2536_s3 + $0x38] sm:$0xff] (!%p289_p2) }
   0x9   : > { %2034 = vmatpush3.bf16.msra.mxu0 (!%p289_p2), %v2031_v3  ;;  %2040 = vmatprep.subr.bf16.mxu1 (!%p289_p2), %v2039_v8  ;;  %v2047_v14 = vpack.c.bf16 (!%p289_p2), %v658_v13, %v657_v12  ;;  %v2051_v41 = vpack.c.bf16 (!%p289_p2), %v660_v40, %v659_v39  ;;  %v950_v42 = vld [vmem:[%s2538_s5] sm:$0xff] (!%p289_p2)  ;;  %v951_v43 = vld [vmem:[%s2538_s5 + $0x8] sm:$0xff] (!%p289_p2)  ;;  %v952_v44 = vld [vmem:[%s2538_s5 + $0x10] sm:$0xff] (!%p289_p2) }
   0xa   : > { %2036 = vmatprep.subr.bf16.mxu0 (!%p289_p2), %v2035_v7  ;;  %2042 = vmatpush3.bf16.msra.mxu1 (!%p289_p2), %v2039_v8  ;;  %v2055_v45 = vpack.c.bf16 (!%p289_p2), %v951_v43, %v950_v42  ;;  %v953_v46 = vld [vmem:[%s2538_s5 + $0x18] sm:$0xff] (!%p289_p2)  ;;  %v954_v48 = vld [vmem:[%s2538_s5 + $0x20] sm:$0xff] (!%p289_p2)  ;;  %v955_v49 = vld [vmem:[%s2538_s5 + $0x28] sm:$0xff] (!%p289_p2) }
   0xb   : > { %2044 = vmatprep.subr.bf16.mxu1 (!%p289_p2), %v2043_v11  ;;  %v2059_v47 = vpack.c.bf16 (!%p289_p2), %v953_v46, %v952_v44  ;;  %v2063_v50 = vpack.c.bf16 (!%p289_p2), %v955_v49, %v954_v48  ;;  %v956_v51 = vld [vmem:[%s2538_s5 + $0x30] sm:$0xff] (!%p289_p2)  ;;  %v957_v52 = vld [vmem:[%s2538_s5 + $0x38] sm:$0xff] (!%p289_p2)  ;;  %v2290_v54 = vld [vmem:[%s2535_s2] ss:$0 sm:$0xff] (!%p289_p2) }
   0xc   : > { %v2067_v53 = vpack.c.bf16 (!%p289_p2), %v957_v52, %v956_v51 }
   0xd   : > { %s2544_s17 = smov (!%p325_p3, %s324_s17), 47  ;;  %2038 = vmatpush3.bf16.msra.mxu0 %v2035_v7 }
   0xe   : > { %s1603_s12 = sshll.u32 %s2544_s17, 3  ;;  %2046 = vmatpush3.bf16.msra.mxu1 %v2043_v11  ;;  %2056 = vmatprep.subr.bf16.mxu0 %v2055_v45 }
   0xf   : > { %s2207_s15 = scalar_lea.vmem %s2533_s0, %s1603_s12  ;;  %2048 = vmatprep.subr.bf16.mxu1 %v2047_v14  ;;  %s2480_s27 = scalar_lea.vmem %s2542_s9, %s1603_s12 }
  0x10   : > { %v336_v15 = vld [vmem:[%s2207_s15] sm:$0xff]  ;;  %v337_v16 = vld [vmem:[%s2207_s15 + $0x8] sm:$0xff]  ;;  %v338_v17 = vld [vmem:[%s2207_s15 + $0x10] sm:$0xff] }
  0x11   : > { %1839 = vmatprep.mubr.msk.f32.mxu0 %vm371_vm0, %v336_v15  ;;  %v339_v18 = vld [vmem:[%s2207_s15 + $0x18] sm:$0xff]  ;;  %v340_v19 = vld [vmem:[%s2207_s15 + $0x20] sm:$0xff]  ;;  %v341_v20 = vld [vmem:[%s2207_s15 + $0x28] sm:$0xff] }
  0x12   : > { %1840 = vmatmul.mubr.msk.f32.vlgmr.msra.gmra.mrb[0].mxu0 %vm371_vm0, %v337_v16  ;;  %2050 = vmatpush3.bf16.msra.mxu1 %v2047_v14  ;;  %v342_v21 = vld [vmem:[%s2207_s15 + $0x30] sm:$0xff]  ;;  %v343_v22 = vld [vmem:[%s2207_s15 + $0x38] sm:$0xff]  ;;  %v344_v23 = vld [vmem:[%s2207_s15 + $0x40] sm:$0xff] }
  0x13   : > { %1842 = vmatprep.mubr.msk.f32.mxu0 %vm371_vm0, %v338_v17  ;;  %v345_v24 = vld [vmem:[%s2207_s15 + $0x48] sm:$0xff]  ;;  %v346_v25 = vld [vmem:[%s2207_s15 + $0x50] sm:$0xff]  ;;  %v347_v26 = vld [vmem:[%s2207_s15 + $0x58] sm:$0xff]  ;;  %2052 = vmatprep.subr.bf16.mxu1 %v2051_v41 }
  0x14   : > { %v348_v27 = vld [vmem:[%s2207_s15 + $0x60] sm:$0xff]  ;;  %v349_v28 = vld [vmem:[%s2207_s15 + $0x68] sm:$0xff]  ;;  %v350_v29 = vld [vmem:[%s2207_s15 + $0x70] sm:$0xff]  ;;  %2058 = vmatpush3.bf16.msra.mxu0 %v2055_v45 }
  0x15   : > { %v351_v30 = vld [vmem:[%s2207_s15 + $0x78] sm:$0xff]  ;;  %v352_v31 = vld [vmem:[%s2207_s15 + $0x80] sm:$0xff]  ;;  %v353_v32 = vld [vmem:[%s2207_s15 + $0x88] sm:$0xff]  ;;  %2060 = vmatprep.subr.bf16.mxu0 %v2059_v47 }
  0x16   : > { %1843 = vmatmul.mubr.msk.f32.gmra.mrb[2].mxu0 %vm371_vm0, %v339_v18  ;;  %v354_v33 = vld [vmem:[%s2207_s15 + $0x90] sm:$0xff]  ;;  %v355_v34 = vld [vmem:[%s2207_s15 + $0x98] sm:$0xff]  ;;  %v356_v35 = vld [vmem:[%s2207_s15 + $0xa0] sm:$0xff]  ;;  %2054 = vmatpush3.bf16.msra.mxu1 %v2051_v41 }
  0x17   : > { %1845 = vmatprep.mubr.msk.f32.mxu0 %vm371_vm0, %v340_v19  ;;  %v357_v36 = vld [vmem:[%s2207_s15 + $0xa8] sm:$0xff]  ;;  %v358_v37 = vld [vmem:[%s2207_s15 + $0xb0] sm:$0xff]  ;;  %v359_v38 = vld [vmem:[%s2207_s15 + $0xb8] sm:$0xff] }
  0x18   : > { %2062 = vmatpush3.bf16.msra.mxu0 %v2059_v47 }
  0x19   : > { %2064 = vmatprep.subr.bf16.mxu0 %v2063_v50 }
  0x1a   : > { %1846 = vmatmul.mubr.msk.f32.gmra.mrb[4].mxu0 %vm371_vm0, %v341_v20 }
  0x1b   : > { %1848 = vmatprep.mubr.msk.f32.mxu0 %vm371_vm0, %v342_v21 }
  0x1c   : > { %2066 = vmatpush3.bf16.msra.mxu0 %v2063_v50 }
  0x1d   : > { %2068 = vmatprep.subr.bf16.mxu0 %v2067_v53 }
  0x1e   : > { %1849 = vmatmul.mubr.msk.f32.gmra.mrb[6].mxu0 %vm371_vm0, %v343_v22 }
  0x1f   : > { %1851 = vmatprep.mubr.msk.f32.mxu0 %vm371_vm0, %v344_v23 }
  0x20   : > { %2070 = vmatpush3.bf16.msra.mxu0 %v2067_v53 }
  0x22   : > { %1852 = vmatmul.mubr.msk.f32.gmra.mrb[8].mxu0 %vm371_vm0, %v345_v24 }
  0x23   : > { %1854 = vmatprep.mubr.msk.f32.mxu0 %vm371_vm0, %v346_v25 }
  0x26   : > { %1855 = vmatmul.mubr.msk.f32.gmra.mrb[10].mxu0 %vm371_vm0, %v347_v26 }
  0x27   : > { %1857 = vmatprep.mubr.msk.f32.mxu0 %vm371_vm0, %v348_v27 }
  0x2a   : > { %1858 = vmatmul.mubr.msk.f32.gmra.mrb[12].mxu0 %vm371_vm0, %v349_v28 }
  0x2b   : > { %1860 = vmatprep.mubr.msk.f32.mxu0 %vm371_vm0, %v350_v29 }
  0x2e   : > { %1861 = vmatmul.mubr.msk.f32.gmra.mrb[14].mxu0 %vm371_vm0, %v351_v30 }
  0x2f   : > { %1863 = vmatprep.mubr.msk.f32.mxu0 %vm371_vm0, %v352_v31 }
  0x32   : > { %1864 = vmatmul.mubr.msk.f32.gmra.mrb[16].mxu0 %vm371_vm0, %v353_v32 }
  0x33   : > { %1866 = vmatprep.mubr.msk.f32.mxu0 %vm371_vm0, %v354_v33 }
  0x36   : > { %1867 = vmatmul.mubr.msk.f32.gmra.mrb[18].mxu0 %vm371_vm0, %v355_v34 }
  0x37   : > { %1869 = vmatprep.mubr.msk.f32.mxu0 %vm371_vm0, %v356_v35 }
  0x3a   : > { %1870 = vmatmul.mubr.msk.f32.gmra.mrb[20].mxu0 %vm371_vm0, %v357_v36 }
  0x3b   : > { %1872 = vmatprep.mubr.msk.f32.mxu0 %vm371_vm0, %v358_v37 }
  0x3e   : > { %1873 = vmatmul.mubr.msk.f32.gmra.mrb[22].mxu0 %vm371_vm0, %v359_v38 }
  0xe5   : > { %v1841_v55 = vpop.f32.mrb[0].mxu0 }
  0xe6   : > { %v516_v56 = vadd.f32 %v1841_v55, %v2290_v54  ;;  %v510_v57 = vpop.f32.mrb[1].mxu0 }
  0xe7   : > { %v511_v58 = vadd.f32 %v2290_v54, %v510_v57 }
  0xe8   : > { %v630_v61 = vmax.f32 %v516_v56, 0.0 }
  0xe9   : > { %v629_v59 = vmax.f32 %v511_v58, 0.0  ;;  %v1844_v60 = vpop.f32.mrb[2].mxu0 }
  0xea   : > { %v526_v62 = vadd.f32 %v1844_v60, %v2290_v54  ;;  %v520_v63 = vpop.f32.mrb[3].mxu0 }
  0xeb   : > { %v521_v0 = vadd.f32 %v2290_v54, %v520_v63  ;;  %1891 = vmatprep.mubr.msk.f32.mxu1 %vm668_vm1, %v629_v59 }
  0xec   : > { %1892 = vmatmul.mubr.msk.f32.vlgmr.msra.gmra.mrb[0].mxu1 %vm668_vm1, %v630_v61  ;;  %v632_v3 = vmax.f32 %v526_v62, 0.0 }
  0xed   : > { %v631_v1 = vmax.f32 %v521_v0, 0.0  ;;  %v1847_v2 = vpop.f32.mrb[4].mxu0  ;;  %v1246_v0 = vld [vmem:[%s2540_s7] sm:$0xff] }
  0xee   : > { %v536_v4 = vadd.f32 %v1847_v2, %v2290_v54  ;;  %v530_v5 = vpop.f32.mrb[5].mxu0 }
  0xef   : > { %v531_v6 = vadd.f32 %v2290_v54, %v530_v5  ;;  %1894 = vmatprep.mubr.msk.f32.mxu1 %vm668_vm1, %v631_v1  ;;  %v1247_v1 = vld [vmem:[%s2540_s7 + $0x8] sm:$0xff]  ;;  %v1250_v5 = vld [vmem:[%s2540_s7 + $0x20] sm:$0xff] }
  0xf0   : > { %1895 = vmatmul.mubr.msk.f32.gmra.mrb[2].mxu1 %vm668_vm1, %v632_v3  ;;  %v634_v9 = vmax.f32 %v536_v4, 0.0  ;;  %v2071_v2 = vpack.c.bf16 %v1247_v1, %v1246_v0  ;;  %v1249_v3 = vld [vmem:[%s2540_s7 + $0x18] sm:$0xff] }
  0xf1   : > { %v633_v7 = vmax.f32 %v531_v6, 0.0  ;;  %v1850_v8 = vpop.f32.mrb[6].mxu0  ;;  %v1251_v6 = vld [vmem:[%s2540_s7 + $0x28] sm:$0xff] }
  0xf2   : > { %v546_v10 = vadd.f32 %v1850_v8, %v2290_v54  ;;  %v540_v11 = vpop.f32.mrb[7].mxu0  ;;  %2087 = vmatprep.subr.bf16.mxu1 %v2071_v2  ;;  %2072 = vmatprep.subr.bf16.mxu0 %v2071_v2  ;;  %v1252_v8 = vld [vmem:[%s2540_s7 + $0x30] sm:$0xff] }
  0xf3   : > { %v541_v12 = vadd.f32 %v2290_v54, %v540_v11  ;;  %1897 = vmatprep.mubr.msk.f32.mxu1 %vm668_vm1, %v633_v7  ;;  %2091 = vmatpush3.bf16.msra.mxu1 %v2071_v2  ;;  %v2079_v7 = vpack.c.bf16 %v1251_v6, %v1250_v5  ;;  %v2367_v11 = vld [vmem:[%s2537_s4] ss:$0 sm:$0xff] }
  0xf4   : > { %1898 = vmatmul.mubr.msk.f32.gmra.mrb[4].mxu1 %vm668_vm1, %v634_v9  ;;  %v636_v15 = vmax.f32 %v546_v10, 0.0  ;;  %v1253_v9 = vld [vmem:[%s2540_s7 + $0x38] sm:$0xff] }
  0xf5   : > { %v635_v13 = vmax.f32 %v541_v12, 0.0  ;;  %v1853_v14 = vpop.f32.mrb[8].mxu0  ;;  %v2083_v10 = vpack.c.bf16 %v1253_v9, %v1252_v8 }
  0xf6   : > { %v556_v16 = vadd.f32 %v1853_v14, %v2290_v54  ;;  %v550_v17 = vpop.f32.mrb[9].mxu0 }
  0xf7   : > { %v551_v18 = vadd.f32 %v2290_v54, %v550_v17  ;;  %1900 = vmatprep.mubr.msk.f32.mxu1 %vm668_vm1, %v635_v13 }
  0xf8   : > { %1901 = vmatmul.mubr.msk.f32.gmra.mrb[6].mxu1 %vm668_vm1, %v636_v15  ;;  %v638_v21 = vmax.f32 %v556_v16, 0.0 }
  0xf9   : > { %v637_v19 = vmax.f32 %v551_v18, 0.0  ;;  %v1856_v20 = vpop.f32.mrb[10].mxu0 }
  0xfa   : > { %v566_v22 = vadd.f32 %v1856_v20, %v2290_v54  ;;  %v560_v23 = vpop.f32.mrb[11].mxu0 }
  0xfb   : > { %v561_v24 = vadd.f32 %v2290_v54, %v560_v23  ;;  %1903 = vmatprep.mubr.msk.f32.mxu1 %vm668_vm1, %v637_v19 }
  0xfc   : > { %1904 = vmatmul.mubr.msk.f32.gmra.mrb[8].mxu1 %vm668_vm1, %v638_v21  ;;  %v640_v27 = vmax.f32 %v566_v22, 0.0 }
  0xfd   : > { %v639_v25 = vmax.f32 %v561_v24, 0.0  ;;  %v1859_v26 = vpop.f32.mrb[12].mxu0 }
  0xfe   : > { %v576_v28 = vadd.f32 %v1859_v26, %v2290_v54  ;;  %v570_v29 = vpop.f32.mrb[13].mxu0 }
  0xff   : > { %v571_v30 = vadd.f32 %v2290_v54, %v570_v29  ;;  %1906 = vmatprep.mubr.msk.f32.mxu1 %vm668_vm1, %v639_v25 }
 0x100   : > { %1907 = vmatmul.mubr.msk.f32.gmra.mrb[10].mxu1 %vm668_vm1, %v640_v27  ;;  %v642_v33 = vmax.f32 %v576_v28, 0.0 }
 0x101   : > { %v641_v31 = vmax.f32 %v571_v30, 0.0  ;;  %v1862_v32 = vpop.f32.mrb[14].mxu0 }
 0x102   : > { %v586_v34 = vadd.f32 %v1862_v32, %v2290_v54  ;;  %v580_v35 = vpop.f32.mrb[15].mxu0 }
 0x103   : > { %v581_v36 = vadd.f32 %v2290_v54, %v580_v35  ;;  %1909 = vmatprep.mubr.msk.f32.mxu1 %vm668_vm1, %v641_v31 }
 0x104   : > { %1910 = vmatmul.mubr.msk.f32.gmra.mrb[12].mxu1 %vm668_vm1, %v642_v33  ;;  %v644_v39 = vmax.f32 %v586_v34, 0.0 }
 0x105   : > { %v643_v37 = vmax.f32 %v581_v36, 0.0  ;;  %v1865_v38 = vpop.f32.mrb[16].mxu0 }
 0x106   : > { %v596_v40 = vadd.f32 %v1865_v38, %v2290_v54  ;;  %v590_v41 = vpop.f32.mrb[17].mxu0 }
 0x107   : > { %v591_v42 = vadd.f32 %v2290_v54, %v590_v41  ;;  %1912 = vmatprep.mubr.msk.f32.mxu1 %vm668_vm1, %v643_v37 }
 0x108   : > { %1913 = vmatmul.mubr.msk.f32.gmra.mrb[14].mxu1 %vm668_vm1, %v644_v39  ;;  %v646_v45 = vmax.f32 %v596_v40, 0.0 }
 0x109   : > { %v645_v43 = vmax.f32 %v591_v42, 0.0  ;;  %v1868_v44 = vpop.f32.mrb[18].mxu0 }
 0x10a   : > { %v606_v46 = vadd.f32 %v1868_v44, %v2290_v54  ;;  %v600_v47 = vpop.f32.mrb[19].mxu0 }
 0x10b   : > { %v601_v48 = vadd.f32 %v2290_v54, %v600_v47  ;;  %1915 = vmatprep.mubr.msk.f32.mxu1 %vm668_vm1, %v645_v43 }
 0x10c   : > { %1916 = vmatmul.mubr.msk.f32.gmra.mrb[16].mxu1 %vm668_vm1, %v646_v45  ;;  %v648_v51 = vmax.f32 %v606_v46, 0.0 }
 0x10d   : > { %v647_v49 = vmax.f32 %v601_v48, 0.0  ;;  %v1871_v50 = vpop.f32.mrb[20].mxu0 }
 0x10e   : > { %v616_v52 = vadd.f32 %v1871_v50, %v2290_v54  ;;  %v610_v53 = vpop.f32.mrb[21].mxu0 }
 0x10f   : > { %v611_v55 = vadd.f32 %v2290_v54, %v610_v53  ;;  %1918 = vmatprep.mubr.msk.f32.mxu1 %vm668_vm1, %v647_v49 }
 0x110   : > { %1919 = vmatmul.mubr.msk.f32.gmra.mrb[18].mxu1 %vm668_vm1, %v648_v51  ;;  %v650_v58 = vmax.f32 %v616_v52, 0.0 }
 0x111   : > { %v649_v56 = vmax.f32 %v611_v55, 0.0  ;;  %v1874_v57 = vpop.f32.mrb[22].mxu0 }
 0x112   : > { %v626_v59 = vadd.f32 %v1874_v57, %v2290_v54  ;;  %v620_v60 = vpop.f32.mrb[23].mxu0 }
 0x113   : > { %v621_v61 = vadd.f32 %v2290_v54, %v620_v60  ;;  %1921 = vmatprep.mubr.msk.f32.mxu1 %vm668_vm1, %v649_v56  ;;  %v1248_v54 = vld [vmem:[%s2540_s7 + $0x10] sm:$0xff] }
 0x114   : > { %1922 = vmatmul.mubr.msk.f32.gmra.mrb[20].mxu1 %vm668_vm1, %v650_v58  ;;  %v652_v63 = vmax.f32 %v626_v59, 0.0  ;;  %v2075_v4 = vpack.c.bf16 %v1249_v3, %v1248_v54 }
 0x115   : > { %v651_v62 = vmax.f32 %v621_v61, 0.0 }
 0x116   : > { %2088 = vmatprep.subr.bf16.mxu1 %v2075_v4 }
 0x117   : > { %1924 = vmatprep.mubr.msk.f32.mxu1 %vm668_vm1, %v651_v62  ;;  %2092 = vmatpush3.bf16.msra.mxu1 %v2075_v4 }
 0x118   : > { %1925 = vmatmul.mubr.msk.f32.gmra.mrb[22].mxu1 %vm668_vm1, %v652_v63  ;;  %2089 = vmatprep.subr.bf16.mxu1 %v2079_v7 }
 0x11b   : > { %2093 = vmatpush3.bf16.msra.mxu1 %v2079_v7 }
 0x11c   : > { %2090 = vmatprep.subr.bf16.mxu1 %v2083_v10 }
 0x11f   : > { %2094 = vmatpush3.bf16.msra.mxu1 %v2083_v10 }
 0x1bf   : > { %v1893_v12 = vpop.f32.mrb[0].mxu1 }
 0x1c0   : > { %v813_v13 = vadd.f32 %v1893_v12, %v2367_v11  ;;  %v807_v14 = vpop.f32.mrb[1].mxu1 }
 0x1c1   : > { %v808_v15 = vadd.f32 %v2367_v11, %v807_v14 }
 0x1c2   : > { %v927_v18 = vmax.f32 %v813_v13, 0.0 }
 0x1c3   : > { %v926_v16 = vmax.f32 %v808_v15, 0.0  ;;  %v1896_v17 = vpop.f32.mrb[2].mxu1 }
 0x1c4   : > { %v823_v19 = vadd.f32 %v1896_v17, %v2367_v11  ;;  %v817_v20 = vpop.f32.mrb[3].mxu1 }
 0x1c5   : > { %v818_v21 = vadd.f32 %v2367_v11, %v817_v20  ;;  %1943 = vmatprep.mubr.msk.f32.mxu0 %vm668_vm1, %v926_v16 }
 0x1c6   : > { %1944 = vmatmul.mubr.msk.f32.vlgmr.msra.gmra.mrb[24].mxu0 %vm668_vm1, %v927_v18  ;;  %v929_v24 = vmax.f32 %v823_v19, 0.0 }
 0x1c7   : > { %v928_v22 = vmax.f32 %v818_v21, 0.0  ;;  %v1899_v23 = vpop.f32.mrb[4].mxu1  ;;  %2074 = vmatpush3.bf16.msra.mxu0 %v2071_v2  ;;  %v2420_v21 = vld [vmem:[%s2539_s6] ss:$0 sm:$0xff] }
 0x1c8   : > { %v833_v25 = vadd.f32 %v1899_v23, %v2367_v11  ;;  %v827_v26 = vpop.f32.mrb[5].mxu1  ;;  %2076 = vmatprep.subr.bf16.mxu0 %v2075_v4 }
 0x1c9   : > { %v828_v27 = vadd.f32 %v2367_v11, %v827_v26  ;;  %1946 = vmatprep.mubr.msk.f32.mxu0 %vm668_vm1, %v928_v22 }
 0x1ca   : > { %1947 = vmatmul.mubr.msk.f32.gmra.mrb[26].mxu0 %vm668_vm1, %v929_v24  ;;  %v931_v30 = vmax.f32 %v833_v25, 0.0 }
 0x1cb   : > { %v930_v28 = vmax.f32 %v828_v27, 0.0  ;;  %v1902_v29 = vpop.f32.mrb[6].mxu1  ;;  %2078 = vmatpush3.bf16.msra.mxu0 %v2075_v4 }
 0x1cc   : > { %v843_v31 = vadd.f32 %v1902_v29, %v2367_v11  ;;  %v837_v32 = vpop.f32.mrb[7].mxu1  ;;  %2080 = vmatprep.subr.bf16.mxu0 %v2079_v7 }
 0x1cd   : > { %v838_v33 = vadd.f32 %v2367_v11, %v837_v32  ;;  %1949 = vmatprep.mubr.msk.f32.mxu0 %vm668_vm1, %v930_v28 }
 0x1ce   : > { %1950 = vmatmul.mubr.msk.f32.gmra.mrb[28].mxu0 %vm668_vm1, %v931_v30  ;;  %v933_v36 = vmax.f32 %v843_v31, 0.0 }
 0x1cf   : > { %v932_v34 = vmax.f32 %v838_v33, 0.0  ;;  %v1905_v35 = vpop.f32.mrb[8].mxu1  ;;  %2082 = vmatpush3.bf16.msra.mxu0 %v2079_v7 }
 0x1d0   : > { %v853_v37 = vadd.f32 %v1905_v35, %v2367_v11  ;;  %v847_v38 = vpop.f32.mrb[9].mxu1  ;;  %2084 = vmatprep.subr.bf16.mxu0 %v2083_v10 }
 0x1d1   : > { %v848_v39 = vadd.f32 %v2367_v11, %v847_v38  ;;  %1952 = vmatprep.mubr.msk.f32.mxu0 %vm668_vm1, %v932_v34 }
 0x1d2   : > { %1953 = vmatmul.mubr.msk.f32.gmra.mrb[30].mxu0 %vm668_vm1, %v933_v36  ;;  %v935_v42 = vmax.f32 %v853_v37, 0.0 }
 0x1d3   : > { %v934_v40 = vmax.f32 %v848_v39, 0.0  ;;  %v1908_v41 = vpop.f32.mrb[10].mxu1  ;;  %2086 = vmatpush3.bf16.msra.mxu0 %v2083_v10 }
 0x1d4   : > { %v863_v43 = vadd.f32 %v1908_v41, %v2367_v11  ;;  %v857_v44 = vpop.f32.mrb[11].mxu1 }
 0x1d5   : > { %v858_v45 = vadd.f32 %v2367_v11, %v857_v44  ;;  %1955 = vmatprep.mubr.msk.f32.mxu0 %vm668_vm1, %v934_v40 }
 0x1d6   : > { %1956 = vmatmul.mubr.msk.f32.gmra.mrb[32].mxu0 %vm668_vm1, %v935_v42  ;;  %v937_v48 = vmax.f32 %v863_v43, 0.0 }
 0x1d7   : > { %v936_v46 = vmax.f32 %v858_v45, 0.0  ;;  %v1911_v47 = vpop.f32.mrb[12].mxu1 }
 0x1d8   : > { %v873_v49 = vadd.f32 %v1911_v47, %v2367_v11  ;;  %v867_v50 = vpop.f32.mrb[13].mxu1 }
 0x1d9   : > { %v868_v51 = vadd.f32 %v2367_v11, %v867_v50  ;;  %1958 = vmatprep.mubr.msk.f32.mxu0 %vm668_vm1, %v936_v46 }
 0x1da   : > { %1959 = vmatmul.mubr.msk.f32.gmra.mrb[34].mxu0 %vm668_vm1, %v937_v48  ;;  %v939_v55 = vmax.f32 %v873_v49, 0.0 }
 0x1db   : > { %v938_v52 = vmax.f32 %v868_v51, 0.0  ;;  %v1914_v53 = vpop.f32.mrb[14].mxu1 }
 0x1dc   : > { %v883_v56 = vadd.f32 %v1914_v53, %v2367_v11  ;;  %v877_v57 = vpop.f32.mrb[15].mxu1 }
 0x1dd   : > { %v878_v58 = vadd.f32 %v2367_v11, %v877_v57  ;;  %1961 = vmatprep.mubr.msk.f32.mxu0 %vm668_vm1, %v938_v52 }
 0x1de   : > { %1962 = vmatmul.mubr.msk.f32.gmra.mrb[36].mxu0 %vm668_vm1, %v939_v55  ;;  %v941_v61 = vmax.f32 %v883_v56, 0.0 }
 0x1df   : > { %v940_v59 = vmax.f32 %v878_v58, 0.0  ;;  %v1917_v60 = vpop.f32.mrb[16].mxu1 }
 0x1e0   : > { %v893_v62 = vadd.f32 %v1917_v60, %v2367_v11  ;;  %v887_v63 = vpop.f32.mrb[17].mxu1 }
 0x1e1   : > { %v888_v0 = vadd.f32 %v2367_v11, %v887_v63  ;;  %1964 = vmatprep.mubr.msk.f32.mxu0 %vm668_vm1, %v940_v59 }
 0x1e2   : > { %1965 = vmatmul.mubr.msk.f32.gmra.mrb[38].mxu0 %vm668_vm1, %v941_v61  ;;  %v943_v2 = vmax.f32 %v893_v62, 0.0 }
 0x1e3   : > { %v942_v1 = vmax.f32 %v888_v0, 0.0  ;;  %v1920_v54 = vpop.f32.mrb[18].mxu1 }
 0x1e4   : > { %v903_v3 = vadd.f32 %v1920_v54, %v2367_v11  ;;  %v897_v4 = vpop.f32.mrb[19].mxu1 }
 0x1e5   : > { %v898_v5 = vadd.f32 %v2367_v11, %v897_v4  ;;  %1967 = vmatprep.mubr.msk.f32.mxu0 %vm668_vm1, %v942_v1 }
 0x1e6   : > { %1968 = vmatmul.mubr.msk.f32.gmra.mrb[40].mxu0 %vm668_vm1, %v943_v2  ;;  %v945_v8 = vmax.f32 %v903_v3, 0.0 }
 0x1e7   : > { %v944_v6 = vmax.f32 %v898_v5, 0.0  ;;  %v1923_v7 = vpop.f32.mrb[20].mxu1 }
 0x1e8   : > { %v913_v9 = vadd.f32 %v1923_v7, %v2367_v11  ;;  %v907_v10 = vpop.f32.mrb[21].mxu1 }
 0x1e9   : > { %v908_v12 = vadd.f32 %v2367_v11, %v907_v10  ;;  %1970 = vmatprep.mubr.msk.f32.mxu0 %vm668_vm1, %v944_v6 }
 0x1ea   : > { %1971 = vmatmul.mubr.msk.f32.gmra.mrb[42].mxu0 %vm668_vm1, %v945_v8  ;;  %v947_v15 = vmax.f32 %v913_v9, 0.0 }
 0x1eb   : > { %v946_v13 = vmax.f32 %v908_v12, 0.0  ;;  %v1926_v14 = vpop.f32.mrb[22].mxu1 }
 0x1ec   : > { %v923_v16 = vadd.f32 %v1926_v14, %v2367_v11  ;;  %v917_v17 = vpop.f32.mrb[23].mxu1 }
 0x1ed   : > { %v918_v18 = vadd.f32 %v2367_v11, %v917_v17  ;;  %1973 = vmatprep.mubr.msk.f32.mxu0 %vm668_vm1, %v946_v13 }
 0x1ee   : > { %1974 = vmatmul.mubr.msk.f32.gmra.mrb[44].mxu0 %vm668_vm1, %v947_v15  ;;  %v949_v20 = vmax.f32 %v923_v16, 0.0 }
 0x1ef   : > { %v948_v19 = vmax.f32 %v918_v18, 0.0 }
 0x1f1   : > { %1976 = vmatprep.mubr.msk.f32.mxu0 %vm668_vm1, %v948_v19 }
 0x1f2   : > { %1977 = vmatmul.mubr.msk.f32.gmra.mrb[46].mxu0 %vm668_vm1, %v949_v20 }
 0x299   : > { %v1945_v22 = vpop.f32.mrb[24].mxu0 }
 0x29a   : > { %v1109_v23 = vadd.f32 %v1945_v22, %v2420_v21  ;;  %v1103_v24 = vpop.f32.mrb[25].mxu0 }
 0x29b   : > { %v1104_v11 = vadd.f32 %v2420_v21, %v1103_v24 }
 0x29c   : > { %v1223_v27 = vmax.f32 %v1109_v23, 0.0 }
 0x29d   : > { %v1222_v25 = vmax.f32 %v1104_v11, 0.0  ;;  %v1948_v26 = vpop.f32.mrb[26].mxu0 }
 0x29e   : > { %v1119_v28 = vadd.f32 %v1948_v26, %v2420_v21  ;;  %v1113_v29 = vpop.f32.mrb[27].mxu0 }
 0x29f   : > { %v1114_v30 = vadd.f32 %v2420_v21, %v1113_v29  ;;  %1995 = vmatprep.mubr.msk.f32.mxu0 %vm668_vm1, %v1222_v25 }
 0x2a0   : > { %1996 = vmatmul.mubr.msk.f32.vlgmr.msra.gmra.mrb[48].mxu0 %vm668_vm1, %v1223_v27  ;;  %v1225_v33 = vmax.f32 %v1119_v28, 0.0 }
 0x2a1   : > { %v1224_v31 = vmax.f32 %v1114_v30, 0.0  ;;  %v1951_v32 = vpop.f32.mrb[28].mxu0  ;;  %v2473_v30 = vld [vmem:[%s2541_s8] ss:$0 sm:$0xff] }
 0x2a2   : > { %v1129_v34 = vadd.f32 %v1951_v32, %v2420_v21  ;;  %v1123_v35 = vpop.f32.mrb[29].mxu0 }
 0x2a3   : > { %v1124_v36 = vadd.f32 %v2420_v21, %v1123_v35  ;;  %1998 = vmatprep.mubr.msk.f32.mxu1 %vm668_vm1, %v1224_v31 }
 0x2a4   : > { %1999 = vmatmul.mubr.msk.f32.vlgmr.msra.gmra.mrb[24].mxu1 %vm668_vm1, %v1225_v33  ;;  %v1227_v39 = vmax.f32 %v1129_v34, 0.0 }
 0x2a5   : > { %v1226_v37 = vmax.f32 %v1124_v36, 0.0  ;;  %v1954_v38 = vpop.f32.mrb[30].mxu0 }
 0x2a6   : > { %v1139_v40 = vadd.f32 %v1954_v38, %v2420_v21  ;;  %v1133_v41 = vpop.f32.mrb[31].mxu0 }
 0x2a7   : > { %v1134_v42 = vadd.f32 %v2420_v21, %v1133_v41  ;;  %2001 = vmatprep.mubr.msk.f32.mxu1 %vm668_vm1, %v1226_v37 }
 0x2a8   : > { %2002 = vmatmul.mubr.msk.f32.gmra.mrb[26].mxu1 %vm668_vm1, %v1227_v39  ;;  %v1229_v45 = vmax.f32 %v1139_v40, 0.0 }
 0x2a9   : > { %v1228_v43 = vmax.f32 %v1134_v42, 0.0  ;;  %v1957_v44 = vpop.f32.mrb[32].mxu0 }
 0x2aa   : > { %v1149_v46 = vadd.f32 %v1957_v44, %v2420_v21  ;;  %v1143_v47 = vpop.f32.mrb[33].mxu0 }
 0x2ab   : > { %v1144_v48 = vadd.f32 %v2420_v21, %v1143_v47  ;;  %2004 = vmatprep.mubr.msk.f32.mxu1 %vm668_vm1, %v1228_v43 }
 0x2ac   : > { %2005 = vmatmul.mubr.msk.f32.gmra.mrb[28].mxu1 %vm668_vm1, %v1229_v45  ;;  %v1231_v51 = vmax.f32 %v1149_v46, 0.0 }
 0x2ad   : > { %v1230_v49 = vmax.f32 %v1144_v48, 0.0  ;;  %v1960_v50 = vpop.f32.mrb[34].mxu0 }
 0x2ae   : > { %v1159_v52 = vadd.f32 %v1960_v50, %v2420_v21  ;;  %v1153_v53 = vpop.f32.mrb[35].mxu0 }
 0x2af   : > { %v1154_v55 = vadd.f32 %v2420_v21, %v1153_v53  ;;  %2007 = vmatprep.mubr.msk.f32.mxu1 %vm668_vm1, %v1230_v49 }
 0x2b0   : > { %2008 = vmatmul.mubr.msk.f32.gmra.mrb[30].mxu1 %vm668_vm1, %v1231_v51  ;;  %v1233_v58 = vmax.f32 %v1159_v52, 0.0 }
 0x2b1   : > { %v1232_v56 = vmax.f32 %v1154_v55, 0.0  ;;  %v1963_v57 = vpop.f32.mrb[36].mxu0 }
 0x2b2   : > { %v1169_v59 = vadd.f32 %v1963_v57, %v2420_v21  ;;  %v1163_v60 = vpop.f32.mrb[37].mxu0 }
 0x2b3   : > { %v1164_v61 = vadd.f32 %v2420_v21, %v1163_v60  ;;  %2010 = vmatprep.mubr.msk.f32.mxu1 %vm668_vm1, %v1232_v56 }
 0x2b4   : > { %2011 = vmatmul.mubr.msk.f32.gmra.mrb[32].mxu1 %vm668_vm1, %v1233_v58  ;;  %v1235_v0 = vmax.f32 %v1169_v59, 0.0 }
 0x2b5   : > { %v1234_v62 = vmax.f32 %v1164_v61, 0.0  ;;  %v1966_v63 = vpop.f32.mrb[38].mxu0 }
 0x2b6   : > { %v1179_v1 = vadd.f32 %v1966_v63, %v2420_v21  ;;  %v1173_v54 = vpop.f32.mrb[39].mxu0 }
 0x2b7   : > { %v1174_v2 = vadd.f32 %v2420_v21, %v1173_v54  ;;  %2013 = vmatprep.mubr.msk.f32.mxu1 %vm668_vm1, %v1234_v62 }
 0x2b8   : > { %2014 = vmatmul.mubr.msk.f32.gmra.mrb[34].mxu1 %vm668_vm1, %v1235_v0  ;;  %v1237_v5 = vmax.f32 %v1179_v1, 0.0 }
 0x2b9   : > { %v1236_v3 = vmax.f32 %v1174_v2, 0.0  ;;  %v1969_v4 = vpop.f32.mrb[40].mxu0 }
 0x2ba   : > { %v1189_v6 = vadd.f32 %v1969_v4, %v2420_v21  ;;  %v1183_v7 = vpop.f32.mrb[41].mxu0 }
 0x2bb   : > { %v1184_v8 = vadd.f32 %v2420_v21, %v1183_v7  ;;  %2016 = vmatprep.mubr.msk.f32.mxu1 %vm668_vm1, %v1236_v3 }
 0x2bc   : > { %2017 = vmatmul.mubr.msk.f32.gmra.mrb[36].mxu1 %vm668_vm1, %v1237_v5  ;;  %v1239_v12 = vmax.f32 %v1189_v6, 0.0 }
 0x2bd   : > { %v1238_v9 = vmax.f32 %v1184_v8, 0.0  ;;  %v1972_v10 = vpop.f32.mrb[42].mxu0 }
 0x2be   : > { %v1199_v13 = vadd.f32 %v1972_v10, %v2420_v21  ;;  %v1193_v14 = vpop.f32.mrb[43].mxu0 }
 0x2bf   : > { %v1194_v15 = vadd.f32 %v2420_v21, %v1193_v14  ;;  %2019 = vmatprep.mubr.msk.f32.mxu1 %vm668_vm1, %v1238_v9 }
 0x2c0   : > { %2020 = vmatmul.mubr.msk.f32.gmra.mrb[38].mxu1 %vm668_vm1, %v1239_v12  ;;  %v1241_v18 = vmax.f32 %v1199_v13, 0.0 }
 0x2c1   : > { %v1240_v16 = vmax.f32 %v1194_v15, 0.0  ;;  %v1975_v17 = vpop.f32.mrb[44].mxu0 }
 0x2c2   : > { %v1209_v19 = vadd.f32 %v1975_v17, %v2420_v21  ;;  %v1203_v20 = vpop.f32.mrb[45].mxu0 }
 0x2c3   : > { %v1204_v22 = vadd.f32 %v2420_v21, %v1203_v20  ;;  %2022 = vmatprep.mubr.msk.f32.mxu1 %vm668_vm1, %v1240_v16 }
 0x2c4   : > { %2023 = vmatmul.mubr.msk.f32.gmra.mrb[40].mxu1 %vm668_vm1, %v1241_v18  ;;  %v1243_v11 = vmax.f32 %v1209_v19, 0.0 }
 0x2c5   : > { %v1242_v23 = vmax.f32 %v1204_v22, 0.0  ;;  %v1978_v24 = vpop.f32.mrb[46].mxu0 }
 0x2c6   : > { %v1219_v25 = vadd.f32 %v1978_v24, %v2420_v21  ;;  %v1213_v26 = vpop.f32.mrb[47].mxu0 }
 0x2c7   : > { %v1214_v27 = vadd.f32 %v2420_v21, %v1213_v26  ;;  %2025 = vmatprep.mubr.msk.f32.mxu1 %vm668_vm1, %v1242_v23 }
 0x2c8   : > { %2026 = vmatmul.mubr.msk.f32.gmra.mrb[42].mxu1 %vm668_vm1, %v1243_v11  ;;  %v1245_v29 = vmax.f32 %v1219_v25, 0.0 }
 0x2c9   : > { %v1244_v28 = vmax.f32 %v1214_v27, 0.0 }
 0x2cb   : > { %2028 = vmatprep.mubr.msk.f32.mxu1 %vm668_vm1, %v1244_v28 }
 0x2cc   : > { %2029 = vmatmul.mubr.msk.f32.gmra.mrb[44].mxu1 %vm668_vm1, %v1245_v29 }
 0x373   : > { %v1997_v21 = vpop.f32.mrb[48].mxu0 }
 0x374   : > { %v1405_v31 = vadd.f32 %v1997_v21, %v2473_v30  ;;  %v1399_v32 = vpop.f32.mrb[49].mxu0 }
 0x375   : > { %v1400_v33 = vadd.f32 %v2473_v30, %v1399_v32 }
 0x376   : > { %1519 = vst [vmem:[%s2480_s27 + $0x8] sm:$0xff] %v1405_v31 }
 0x377   : > { %1518 = vst [vmem:[%s2480_s27] sm:$0xff] %v1400_v33  ;;  %v2000_v34 = vpop.f32.mrb[24].mxu1 }
 0x378   : > { %v1415_v35 = vadd.f32 %v2000_v34, %v2473_v30  ;;  %v1409_v36 = vpop.f32.mrb[25].mxu1 }
 0x379   : > { %v1410_v37 = vadd.f32 %v2473_v30, %v1409_v36 }
 0x37a   : > { %1521 = vst [vmem:[%s2480_s27 + $0x18] sm:$0xff] %v1415_v35 }
 0x37b   : > { %1520 = vst [vmem:[%s2480_s27 + $0x10] sm:$0xff] %v1410_v37  ;;  %v2003_v38 = vpop.f32.mrb[26].mxu1 }
 0x37c   : > { %v1425_v39 = vadd.f32 %v2003_v38, %v2473_v30  ;;  %v1419_v40 = vpop.f32.mrb[27].mxu1 }
 0x37d   : > { %v1420_v41 = vadd.f32 %v2473_v30, %v1419_v40 }
 0x37e   : > { %1523 = vst [vmem:[%s2480_s27 + $0x28] sm:$0xff] %v1425_v39 }
 0x37f   : > { %1522 = vst [vmem:[%s2480_s27 + $0x20] sm:$0xff] %v1420_v41  ;;  %v2006_v42 = vpop.f32.mrb[28].mxu1 }
 0x380   : > { %v1435_v43 = vadd.f32 %v2006_v42, %v2473_v30  ;;  %v1429_v44 = vpop.f32.mrb[29].mxu1 }
 0x381   : > { %v1430_v45 = vadd.f32 %v2473_v30, %v1429_v44 }
 0x382   : > { %1525 = vst [vmem:[%s2480_s27 + $0x38] sm:$0xff] %v1435_v43 }
 0x383   : > { %1524 = vst [vmem:[%s2480_s27 + $0x30] sm:$0xff] %v1430_v45  ;;  %v2009_v46 = vpop.f32.mrb[30].mxu1 }
 0x384   : > { %v1445_v47 = vadd.f32 %v2009_v46, %v2473_v30  ;;  %v1439_v48 = vpop.f32.mrb[31].mxu1 }
 0x385   : > { %v1440_v49 = vadd.f32 %v2473_v30, %v1439_v48 }
 0x386   : > { %1527 = vst [vmem:[%s2480_s27 + $0x48] sm:$0xff] %v1445_v47 }
 0x387   : > { %1526 = vst [vmem:[%s2480_s27 + $0x40] sm:$0xff] %v1440_v49  ;;  %v2012_v50 = vpop.f32.mrb[32].mxu1 }
 0x388   : > { %v1455_v51 = vadd.f32 %v2012_v50, %v2473_v30  ;;  %v1449_v52 = vpop.f32.mrb[33].mxu1 }
 0x389   : > { %v1450_v53 = vadd.f32 %v2473_v30, %v1449_v52 }
 0x38a   : > { %1529 = vst [vmem:[%s2480_s27 + $0x58] sm:$0xff] %v1455_v51 }
 0x38b   : > { %1528 = vst [vmem:[%s2480_s27 + $0x50] sm:$0xff] %v1450_v53  ;;  %v2015_v55 = vpop.f32.mrb[34].mxu1 }
 0x38c   : > { %v1465_v56 = vadd.f32 %v2015_v55, %v2473_v30  ;;  %v1459_v57 = vpop.f32.mrb[35].mxu1 }
 0x38d   : > { %v1460_v58 = vadd.f32 %v2473_v30, %v1459_v57 }
 0x38e   : > { %1531 = vst [vmem:[%s2480_s27 + $0x68] sm:$0xff] %v1465_v56 }
 0x38f   : > { %1530 = vst [vmem:[%s2480_s27 + $0x60] sm:$0xff] %v1460_v58  ;;  %v2018_v59 = vpop.f32.mrb[36].mxu1 }
 0x390   : > { %v1475_v60 = vadd.f32 %v2018_v59, %v2473_v30  ;;  %v1469_v61 = vpop.f32.mrb[37].mxu1 }
 0x391   : > { %v1470_v62 = vadd.f32 %v2473_v30, %v1469_v61 }
 0x392   : > { %1533 = vst [vmem:[%s2480_s27 + $0x78] sm:$0xff] %v1475_v60 }
 0x393   : > { %1532 = vst [vmem:[%s2480_s27 + $0x70] sm:$0xff] %v1470_v62  ;;  %v2021_v63 = vpop.f32.mrb[38].mxu1 }
 0x394   : > { %v1485_v0 = vadd.f32 %v2021_v63, %v2473_v30  ;;  %v1479_v1 = vpop.f32.mrb[39].mxu1 }
 0x395   : > { %v1480_v54 = vadd.f32 %v2473_v30, %v1479_v1 }
 0x396   : > { %1535 = vst [vmem:[%s2480_s27 + $0x88] sm:$0xff] %v1485_v0 }
 0x397   : > { %1534 = vst [vmem:[%s2480_s27 + $0x80] sm:$0xff] %v1480_v54  ;;  %v2024_v2 = vpop.f32.mrb[40].mxu1 }
 0x398   : > { %v1495_v3 = vadd.f32 %v2024_v2, %v2473_v30  ;;  %v1489_v4 = vpop.f32.mrb[41].mxu1 }
 0x399   : > { %v1490_v5 = vadd.f32 %v2473_v30, %v1489_v4 }
 0x39a   : > { %1537 = vst [vmem:[%s2480_s27 + $0x98] sm:$0xff] %v1495_v3 }
 0x39b   : > { %1536 = vst [vmem:[%s2480_s27 + $0x90] sm:$0xff] %v1490_v5  ;;  %v2027_v6 = vpop.f32.mrb[42].mxu1 }
 0x39c   : > { %v1505_v7 = vadd.f32 %v2027_v6, %v2473_v30  ;;  %v1499_v8 = vpop.f32.mrb[43].mxu1 }
 0x39d   : > { %v1500_v9 = vadd.f32 %v2473_v30, %v1499_v8 }
 0x39e   : > { %1539 = vst [vmem:[%s2480_s27 + $0xa8] sm:$0xff] %v1505_v7 }
 0x39f   : > { %1538 = vst [vmem:[%s2480_s27 + $0xa0] sm:$0xff] %v1500_v9  ;;  %v2030_v10 = vpop.f32.mrb[44].mxu1 }
 0x3a0   : > { %v1515_v12 = vadd.f32 %v2030_v10, %v2473_v30  ;;  %v1509_v13 = vpop.f32.mrb[45].mxu1 }
 0x3a1   : > { %v1510_v14 = vadd.f32 %v2473_v30, %v1509_v13 }
 0x3a2   : > { %1541 = vst [vmem:[%s2480_s27 + $0xb8] sm:$0xff] %v1515_v12 }
 0x3a3   : > { %1540 = vst [vmem:[%s2480_s27 + $0xb0] sm:$0xff] %v1510_v14 }
 0x3a4 PF: > { %s19_s30 = sadd.s32 1, %s2109_s30  }
 0x3a5   : > { %p16_p4 = scmp.ge.s32.totalorder %s19_s30, 4  }
 0x3a7   :  { %18 = sbr.rel (!%p16_p4) target bundleno = 1 (0x1), region = 86 }

</bundles_post_ra>
